<compile_context>
chip_gen: v7x
topology: tpu7x:2x2x1
jax: 0.10.0
libtpu: 0.0.40
codegen_flags: <defaults>
</compile_context>

<pallas_src>
import jax
import jax.numpy as jnp
from jax.experimental import pallas as pl
from jax.experimental.pallas import tpu as pltpu


def _round_up(x, m):
    return ((x + m - 1) // m) * m


def _divisor_tile(padded, cap):
    """Largest multiple of 128 that divides `padded` (a 128-multiple) and is <= cap."""
    t = min(padded, cap)
    t -= t % 128
    t = max(t, 128)
    while padded % t != 0:
        t -= 128
    return t


def _pick_tm(batch):
    """Whole batch in one tile when small/moderate -> weight streams from HBM once."""
    bp8 = _round_up(max(batch, 1), 8)
    return bp8 if bp8 <= 1024 else 512


def _linear_kernel(x_ref, w_ref, b_ref, o_ref):
    # x_ref: [tm, tk] compute dtype (bf16/f32)
    # w_ref: [tk, tn] compute dtype, weight pre-transposed to [D, C] layout
    # b_ref: [1,  tn] f32
    # o_ref: [tm, tn] f32 -- resident across the k (reduction) axis, used as the
    #                        accumulator directly (no scratch needed for f32 out).
    k = pl.program_id(2)

    @pl.when(k == 0)
    def _():
        o_ref[...] = jnp.broadcast_to(b_ref[...], o_ref.shape)

    o_ref[...] += jnp.dot(x_ref[...], w_ref[...], preferred_element_type=jnp.float32)


def prepare_linear_params(weight, bias, *, compute_dtype=jnp.bfloat16,
                          tn_cap=512, tk_cap=2048):
    """One-time parameter prep.

    weight: [C, D] (PyTorch nn.Linear layout), bias: [C].
    Returns (w_prepped [Dp, Cp] compute_dtype, b_prepped [1, Cp] f32, meta).
    """
    C, D = weight.shape
    assert bias.shape == (C,)

    Cp = _round_up(max(C, 1), 128)
    Dp = _round_up(max(D, 1), 128)

    # tn / tk are divisors of the padded dims -> no re-padding, no wasted work.
    # (For typical head sizes Dp <= tk_cap, so tk == Dp and the k grid axis is 1.)
    tn = _divisor_tile(Cp, tn_cap)
    tk = _divisor_tile(Dp, tk_cap)

    w = weight
    if (Cp, Dp) != (C, D):
        w = jnp.pad(w, ((0, Cp - C), (0, Dp - D)))
    # Pre-transpose once to [D, C] so the kernel issues a plain MXU matmul.
    w = w.T.astype(compute_dtype)                                   # [Dp, Cp]

    b = bias if Cp == C else jnp.pad(bias, (0, Cp - C))
    b = b.reshape(1, Cp).astype(jnp.float32)

    meta = dict(C=C, D=D, Cp=Cp, Dp=Dp, tn=tn, tk=tk, compute_dtype=compute_dtype)
    return w, b, meta


def linear_classifier_forward(features, prepped_params, *, trim=True):
    """features: [B, D]. Returns [B, C] (f32) computed as features @ W^T + b."""
    w, b, meta = prepped_params
    C, D, Cp, Dp = meta["C"], meta["D"], meta["Cp"], meta["Dp"]
    tn, tk = meta["tn"], meta["tk"]
    compute_dtype = meta["compute_dtype"]

    B, Df = features.shape
    assert Df == D, "features last dim must match weight input_dim"

    tm = _pick_tm(B)
    Bp = _round_up(B, tm)

    # v7x megacore: if both parallel axes collapse to one tile, split tn so both
    # TensorCores get work (no-op on single-TC v5e/v6e; x tile is small here).
    if (Bp // tm) * (Cp // tn) == 1 and tn % 256 == 0:
        tn //= 2

    # Per-call we only touch features: pad batch/contraction and cast to the
    # MXU compute dtype. Zero-padding the contraction dim is exact.
    x = features
    if (Bp, Dp) != (B, D):
        x = jnp.pad(x, ((0, Bp - B), (0, Dp - D)))
    x = x.astype(compute_dtype)

    grid = (Bp // tm, Cp // tn, Dp // tk)

    # Explicit scoped-VMEM budget from the real tile footprint (double-buffered
    # inputs + resident f32 output), capped for v7x's 64 MiB physical VMEM.
    isz = jnp.dtype(compute_dtype).itemsize
    footprint = 2 * tm * tk * isz + 2 * tk * tn * isz + 2 * tm * tn * 4 + 2 * tn * 4
    vmem_limit = int(min(max(footprint * 2, 32 << 20), 48 << 20))

    out_padded = pl.pallas_call(
        _linear_kernel,
        out_shape=jax.ShapeDtypeStruct((Bp, Cp), jnp.float32),
        grid_spec=pltpu.PrefetchScalarGridSpec(
            num_scalar_prefetch=0,
            grid=grid,
            in_specs=[
                pl.BlockSpec((tm, tk), lambda i, j, k: (i, k)),   # x
                pl.BlockSpec((tk, tn), lambda i, j, k: (k, j)),   # W^T (pre-transposed)
                pl.BlockSpec((1, tn), lambda i, j, k: (0, j)),    # bias follows class tile
            ],
            out_specs=pl.BlockSpec((tm, tn), lambda i, j, k: (i, j)),
        ),
        compiler_params=pltpu.CompilerParams(
            dimension_semantics=("parallel", "parallel", "arbitrary"),
            vmem_limit_bytes=vmem_limit,
        ),
    )(x, w, b)

    if not trim:
        # Let the consumer take the lane-padded slab and fuse the slice/mask
        # into downstream softmax/argmax to avoid an extra output HBM pass.
        return out_padded
    return out_padded[:B, :C]


if __name__ == "__main__":
    # Shapes implied by the module: features [batch, input_dim] -> [batch, num_classes]
    B, D, C = 8, 32, 2

    key = jax.random.PRNGKey(0)
    kx, kw, kb = jax.random.split(key, 3)

    features = jax.random.normal(kx, (B, D), dtype=jnp.float32)

    # Deterministic nn.Linear-style init: U(-1/sqrt(D), 1/sqrt(D))
    bound = 1.0 / (D ** 0.5)
    weight = jax.random.uniform(kw, (C, D), minval=-bound, maxval=bound,
                                dtype=jnp.float32)   # PyTorch [out, in] layout
    bias = jax.random.uniform(kb, (C,), minval=-bound, maxval=bound,
                              dtype=jnp.float32)

    ref = features @ weight.T + bias

    # f32 compute path: exact match against the plain-JAX reference.
    params_f32 = prepare_linear_params(weight, bias, compute_dtype=jnp.float32)
    out_f32 = jax.block_until_ready(linear_classifier_forward(features, params_f32))
    assert out_f32.shape == (B, C)
    assert jnp.allclose(out_f32, ref, atol=1e-5, rtol=1e-5)

    # Default bf16 MXU-operand path (f32 accumulation): bf16-level tolerance.
    params_bf16 = prepare_linear_params(weight, bias)  # compute_dtype=bf16
    out_bf16 = jax.block_until_ready(linear_classifier_forward(features, params_bf16))
    assert out_bf16.shape == (B, C)
    assert jnp.allclose(out_bf16, ref, atol=3e-2, rtol=3e-2)

    print("KERNEL_OK")
</pallas_src>

<mosaic_0001>
module attributes {stable_mosaic.version = 11 : i64} {
  func.func @_linear_kernel(%arg0: i32, %arg1: i32, %arg2: i32, %arg3: memref<8x128xf32, #tpu.memory_space<vmem>>, %arg4: memref<128x128xf32, #tpu.memory_space<vmem>>, %arg5: memref<1x128xf32, #tpu.memory_space<vmem>>, %arg6: memref<8x128xf32, #tpu.memory_space<vmem>>) attributes {dimension_semantics = [#tpu.dimension_semantics<parallel>, #tpu.dimension_semantics<parallel>, #tpu.dimension_semantics<arbitrary>], iteration_bounds = array<i64: 1, 1, 1>, scalar_prefetch = 0 : i64, scratch_operands = 0 : i64, tpu.core_type = #tpu.core_type<tc>, window_params = [{transform_indices = @transform_0, window_bounds = array<i64: 8, 128>}, {transform_indices = @transform_1, window_bounds = array<i64: 128, 128>}, {transform_indices = @transform_2, window_bounds = array<i64: 1, 128>}, {transform_indices = @transform_3, window_bounds = array<i64: 8, 128>}]} {
    %c0_i32 = arith.constant 0 : i32
    %0 = arith.cmpi eq, %arg2, %c0_i32 : i32
    %1 = arith.extui %0 : i1 to i32
    %c0_i32_0 = arith.constant 0 : i32
    %2 = arith.cmpi ne, %1, %c0_i32_0 : i32
    scf.if %2 {
      %c0_8 = arith.constant 0 : index
      %c0_9 = arith.constant 0 : index
      %9 = vector.load %arg5[%c0_8, %c0_9] : memref<1x128xf32, #tpu.memory_space<vmem>>, vector<1x128xf32>
      %10 = vector.shape_cast %9 : vector<1x128xf32> to vector<1x128xf32>
      %11 = vector.broadcast %10 : vector<1x128xf32> to vector<8x128xf32>
      %c0_10 = arith.constant 0 : index
      %c0_11 = arith.constant 0 : index
      %12 = vector.load %arg6[%c0_10, %c0_11] : memref<8x128xf32, #tpu.memory_space<vmem>>, vector<8x128xf32>
      tpu.vector_store %arg6[%c0_10, %c0_11], %11 {strides = array<i32>} : memref<8x128xf32, #tpu.memory_space<vmem>>, vector<8x128xf32>,
    } else {
    }
    %c0 = arith.constant 0 : index
    %c0_1 = arith.constant 0 : index
    %3 = vector.load %arg6[%c0, %c0_1] : memref<8x128xf32, #tpu.memory_space<vmem>>, vector<8x128xf32>
    %c0_2 = arith.constant 0 : index
    %c0_3 = arith.constant 0 : index
    %4 = vector.load %arg3[%c0_2, %c0_3] : memref<8x128xf32, #tpu.memory_space<vmem>>, vector<8x128xf32>
    %c0_4 = arith.constant 0 : index
    %c0_5 = arith.constant 0 : index
    %5 = vector.load %arg4[%c0_4, %c0_5] : memref<128x128xf32, #tpu.memory_space<vmem>>, vector<128x128xf32>
    %cst = arith.constant dense<0.000000e+00> : vector<8x128xf32>
    %6 = tpu.matmul %4, %5, %cst {dimension_numbers = #tpu.dot_dimension_numbers<[1], [0], [0], [1], [0, 0, 1, 1], [], []>} : vector<8x128xf32>, vector<128x128xf32>, vector<8x128xf32> -> vector<8x128xf32>
    %7 = arith.addf %3, %6 : vector<8x128xf32>
    %c0_6 = arith.constant 0 : index
    %c0_7 = arith.constant 0 : index
    %8 = vector.load %arg6[%c0_6, %c0_7] : memref<8x128xf32, #tpu.memory_space<vmem>>, vector<8x128xf32>
    tpu.vector_store %arg6[%c0_6, %c0_7], %7 {strides = array<i32>} : memref<8x128xf32, #tpu.memory_space<vmem>>, vector<8x128xf32>,
    return
  }
  func.func @transform_0(%arg0: i32, %arg1: i32, %arg2: i32) -> (i32, i32) {
    %c0_i32 = arith.constant 0 : i32
    return %arg0, %arg2 : i32, i32
  }
  func.func @transform_1(%arg0: i32, %arg1: i32, %arg2: i32) -> (i32, i32) {
    %c0_i32 = arith.constant 0 : i32
    return %arg2, %arg1 : i32, i32
  }
  func.func @transform_2(%arg0: i32, %arg1: i32, %arg2: i32) -> (i32, i32) {
    %c0_i32 = arith.constant 0 : i32
    %c0_i32_0 = arith.constant 0 : i32
    return %c0_i32, %arg1 : i32, i32
  }
  func.func @transform_3(%arg0: i32, %arg1: i32, %arg2: i32) -> (i32, i32) {
    %c0_i32 = arith.constant 0 : i32
    return %arg0, %arg1 : i32, i32
  }
}

</mosaic_0001>

<bundles_post_ra>
// kernel: tpu_custom_call.1
= control target key start
LH: loop header
LB: loop body
LE: loop exit
PB: predicated region body
PF: predicated region fallthrough
CT: control target
= control target key end

     0   :  { %8 = vsyncpa [#allocation3], 0  ;;  %s390_s0 = inlined_call_operand.hbm [shape: f32[8,128], index: 0, kind: input, shape index: {}]   ;;  %s391_s1 = inlined_call_operand.hbm [shape: f32[128,128], index: 1, kind: input, shape index: {}]   ;;  %s392_s2 = inlined_call_operand.vmem [shape: f32[1,128], index: 2, kind: input, shape index: {}]   ;;  %s393_s3 = inlined_call_operand.hbm [shape: f32[8,128], index: 3, kind: output, shape index: {}]  }
   0x1   :  { %9 = vsyncpa [#allocation6], 0 }
   0x2   :  { %10 = vsyncpa [#allocation4], 0  ;;  %s316_s12 = smov [#allocation2]   ;;  %s317_s14 = smov [#allocation5]  }
   0x3   :  { %s17_s13 = sshll.u32 %s316_s12, 4  ;;  %s26_s15 = sshll.u32 %s317_s14, 4  ;;  %s18_s13 = int_to_ptr.vmem [resolvable:$true] %s17_s13  ;;  %s344_s15 = int_to_ptr.vmem [resolvable:$true] %s26_s15 }
   0x4   :  { %s244_s18 = scalar_lea.hbm %s390_s0, 128 }
   0x5   :  { %p245_p0 = scmp.ne.s32.totalorder %s390_s0, %s244_s18  ;;  %p248_p1 = scmp.lt.u32.totalorder %s244_s18, %s390_s0 }
   0x7   :  { %p250_p2 = pnand %p248_p1, %p245_p0 }
   0x9   :  { %253 = shalt.err (!%p250_p2)
}
   0xa   :  { %s254_s23 = scalar_lea.vmem %s18_s13, 128  ;;  %p259_p4 = scmp.lt.s32.totalorder %s18_s13, %s18_s13 }
   0xb   :  { %p255_p3 = scmp.ne.s32.totalorder %s18_s13, %s254_s23  ;;  %p260_p5 = scmp.lt.s32.totalorder %s254_s23, %s254_s23 }
   0xd   :  { %p261_p6 = por %p260_p5, %p259_p4 }
   0xf   :  { %p262_p7 = pnand %p261_p6, %p255_p3 }
  0x11   :  { %265 = shalt.err (!%p262_p7)
}
  0x12   :  { %20 = dma.hbm_to_vmem [thread:$0]  %s390_s0, 128, %s18_s13, [#allocation3]  }
  0x13   :  { %s266_s28 = scalar_lea.hbm %s391_s1, 2048 }
  0x14   :  { %p267_p8 = scmp.ne.s32.totalorder %s391_s1, %s266_s28  ;;  %p270_p9 = scmp.lt.u32.totalorder %s266_s28, %s391_s1 }
  0x16   :  { %p272_p10 = pnand %p270_p9, %p267_p8 }
  0x18   :  { %275 = shalt.err (!%p272_p10)
}
  0x19   :  { %s276_s6 = scalar_lea.vmem %s344_s15, 2048  ;;  %p281_p12 = scmp.lt.s32.totalorder %s344_s15, %s344_s15 }
  0x1a   :  { %p277_p11 = scmp.ne.s32.totalorder %s344_s15, %s276_s6  ;;  %p282_p13 = scmp.lt.s32.totalorder %s276_s6, %s276_s6 }
  0x1c   :  { %p283_p0 = por %p282_p13, %p281_p12 }
  0x1e   :  { %p284_p1 = pnand %p283_p0, %p277_p11 }
  0x20   :  { %287 = shalt.err (!%p284_p1)
}
  0x21   :  { %s318_s0 = smov 128   ;;  %s319_s7 = smov 8  }
  0x22   :  { %32 = dma.hbm_to_vmem [thread:$0]  %s391_s1, 2048, %s344_s15, [#allocation6], %s318_s0, %s318_s0, %s319_s7  }
  0x23   :  { %310 = dma.done.wait [#allocation3], 128  }
  0x24   :  { %311 = vsyncadd [#allocation3], 4294967168 }
  0x25   :  { %312 = dma.done.wait [#allocation6], 2048  }
  0x26   :  { %313 = vsyncadd [#allocation6], 4294965248  ;;  %v320_v0 = vmov 0.0|0.0   ;;  %vm321_vm0 = vmmov 0   ;;  %v322_v1 = vmov 0.0   ;;  %v55_v2 = vld [vmem:[#allocation5] sm:$0xff] }
  0x27   :  { %212 = vmatprep.subr.bf16.mxu0 %v320_v0  ;;  %209 = vmatprep.mubr.msk.f32.mxu0 %vm321_vm0, %v322_v1  ;;  %v56_v3 = vld [vmem:[#allocation5 + $0x8] sm:$0xff]  ;;  %v57_v4 = vld [vmem:[#allocation5 + $0x10] sm:$0xff]  ;;  %v58_v6 = vld [vmem:[#allocation5 + $0x18] sm:$0xff]  ;;  %s323_s11 = smov [#allocation7]  }
  0x28   :  { %v213_v5 = vpack.c.bf16 %v56_v3, %v55_v2  ;;  %v216_v7 = vpack.c.bf16 %v58_v6, %v57_v4  ;;  %v59_v8 = vld [vmem:[#allocation5 + $0x20] sm:$0xff]  ;;  %v60_v9 = vld [vmem:[#allocation5 + $0x28] sm:$0xff]  ;;  %v61_v11 = vld [vmem:[#allocation5 + $0x30] sm:$0xff]  ;;  %s149_s12 = sshll.u32 %s323_s11, 4  ;;  %s150_s12 = int_to_ptr.vmem [resolvable:$true] %s149_s12 }
  0x29   :  { %v219_v10 = vpack.c.bf16 %v60_v9, %v59_v8  ;;  %v62_v12 = vld [vmem:[#allocation5 + $0x38] sm:$0xff]  ;;  %v63_v14 = vld [vmem:[#allocation5 + $0x40] sm:$0xff]  ;;  %v64_v15 = vld [vmem:[#allocation5 + $0x48] sm:$0xff]  ;;  %s288_s13 = scalar_lea.vmem %s150_s12, 128  ;;  %p293_p3 = scmp.lt.s32.totalorder %s150_s12, %s150_s12 }
  0x2a   :  { %214 = vmatpush3.bf16.msra.mxu0 %v213_v5  ;;  %v222_v13 = vpack.c.bf16 %v62_v12, %v61_v11  ;;  %v225_v16 = vpack.c.bf16 %v64_v15, %v63_v14  ;;  %v65_v17 = vld [vmem:[#allocation5 + $0x50] sm:$0xff]  ;;  %v66_v18 = vld [vmem:[#allocation5 + $0x58] sm:$0xff]  ;;  %v67_v20 = vld [vmem:[#allocation5 + $0x60] sm:$0xff]  ;;  %p289_p2 = scmp.ne.s32.totalorder %s150_s12, %s288_s13  ;;  %p294_p4 = scmp.lt.s32.totalorder %s288_s13, %s288_s13 }
  0x2b   :  { %215 = vmatprep.subr.bf16.mxu0 %v320_v0  ;;  %v228_v19 = vpack.c.bf16 %v66_v18, %v65_v17  ;;  %v68_v21 = vld [vmem:[#allocation5 + $0x68] sm:$0xff]  ;;  %v69_v23 = vld [vmem:[#allocation5 + $0x70] sm:$0xff]  ;;  %v70_v24 = vld [vmem:[#allocation5 + $0x78] sm:$0xff] }
  0x2c   :  { %v231_v22 = vpack.c.bf16 %v68_v21, %v67_v20  ;;  %v234_v25 = vpack.c.bf16 %v70_v24, %v69_v23  ;;  %v54_v26 = vld [vmem:[#allocation2] sm:$0xff]  ;;  %p295_p5 = por %p294_p4, %p293_p3 }
  0x2d   :  { %v159_v27 = vld [vmem:[%s392_s2] ss:$0 sm:$0xff] }
  0x2e   :  { %217 = vmatpush3.bf16.msra.mxu0 %v216_v7  ;;  %p296_p6 = pnand %p295_p5, %p289_p2 }
  0x2f   :  { %218 = vmatprep.subr.bf16.mxu0 %v320_v0 }
  0x32   :  { %220 = vmatpush3.bf16.msra.mxu0 %v219_v10 }
  0x33   :  { %221 = vmatprep.subr.bf16.mxu0 %v320_v0 }
  0x36   :  { %223 = vmatpush3.bf16.msra.mxu0 %v222_v13 }
  0x37   :  { %224 = vmatprep.subr.bf16.mxu0 %v320_v0 }
  0x3a   :  { %226 = vmatpush3.bf16.msra.mxu0 %v225_v16 }
  0x3b   :  { %227 = vmatprep.subr.bf16.mxu0 %v320_v0 }
  0x3e   :  { %229 = vmatpush3.bf16.msra.mxu0 %v228_v19 }
  0x3f   :  { %230 = vmatprep.subr.bf16.mxu0 %v320_v0 }
  0x42   :  { %232 = vmatpush3.bf16.msra.mxu0 %v231_v22 }
  0x43   :  { %233 = vmatprep.subr.bf16.mxu0 %v320_v0 }
  0x46   :  { %235 = vmatpush3.bf16.msra.mxu0 %v234_v25 }
  0x49   :  { %210 = vmatmul.mubr.f32.vlgmr.msra.gmra.mrb[0].mxu0 %v54_v26 }
 0x11c   :  { %v137_v28 = vpop.f32.mrb[0].mxu0 }
 0x11d   :  { %v141_v29 = vadd.f32 %v159_v27, %v137_v28  ;;  %v211_v30 = vpop.f32.mrb[1].mxu0 }
 0x11f   :  { %142 = vst [vmem:[#allocation7] sm:$0xff] %v141_v29 }
 0x120   :  { %299 = shalt.err (!%p296_p6)
}
 0x121   :  { %s300_s16 = scalar_lea.hbm %s393_s3, 128 }
 0x122   :  { %p301_p7 = scmp.ne.s32.totalorder %s393_s3, %s300_s16  ;;  %p304_p8 = scmp.lt.u32.totalorder %s300_s16, %s393_s3 }
 0x124   :  { %p306_p9 = pnand %p304_p8, %p301_p7 }
 0x126   :  { %309 = shalt.err (!%p306_p9)
}
 0x127   :  { %152 = dma.vmem_to_hbm [thread:$0]  %s150_s12, 128, %s393_s3, [#allocation4]  }
 0x128   :  { %314 = dma.done.wait [#allocation4], 128  }
 0x129   :  { %315 = vsyncadd [#allocation4], 4294967168 }
 0x12a   :  { %156 = vsyncpa [#allocation3], 1 }
 0x12b   :  { %157 = vsyncpa [#allocation6], 1 }
 0x12c   :  { %158 = vsyncpa [#allocation4], 1 }

</bundles_post_ra>
